<compile_context>
chip_gen: v6e
topology: v6e:2x2x1
jax: 0.10.0
libtpu: 0.0.40
codegen_flags: <defaults>
</compile_context>

<pallas_src>
import functools

import jax
import jax.numpy as jnp
from jax import lax
from jax.experimental import pallas as pl
from jax.experimental.pallas import tpu as pltpu

EPS = 1e-5
LANE = 128
SUBLANE = 8
MATMUL_DTYPE = jnp.bfloat16  # MXU input dtype; accumulation is always f32.


def _round_up(n, m):
    return (n + m - 1) // m * m


def _pad2d(a, rows, cols, fill=0.0):
    a = jnp.asarray(a, jnp.float32)
    return jnp.pad(a, ((0, rows - a.shape[0]), (0, cols - a.shape[1])),
                   constant_values=fill)


# --------------------------------------------------------------------------
# FUSED path: whole MLP in one kernel (batch + all weights VMEM resident).
# --------------------------------------------------------------------------
def _fused_mlp_kernel(b_true, n_hidden, masked, x_ref, *refs):
    out_ref = refs[-1]
    prefs = refs[:-1]
    h = x_ref[...]                                        # (Bp, D0) f32
    inv_b = 1.0 / float(b_true)
    if masked:
        rows = lax.broadcasted_iota(jnp.int32, (h.shape[0], 1), 0)
        valid = (rows < b_true).astype(jnp.float32)       # mask padded batch rows

    idx = 0
    for _ in range(n_hidden):
        w_ref, b_ref, g_ref, bt_ref = prefs[idx], prefs[idx + 1], prefs[idx + 2], prefs[idx + 3]
        idx += 4
        h = jnp.dot(h.astype(MATMUL_DTYPE), w_ref[...],
                    preferred_element_type=jnp.float32) + b_ref[...]
        hv = h * valid if masked else h
        mean = jnp.sum(hv, axis=0, keepdims=True) * inv_b
        var = jnp.maximum(jnp.sum(hv * hv, axis=0, keepdims=True) * inv_b
                          - mean * mean, 0.0)
        scale = g_ref[...] * lax.rsqrt(var + EPS)         # EUP rsqrt, f32
        shift = bt_ref[...] - mean * scale
        h = jnp.maximum(h * scale + shift, 0.0)           # BN as one FMA, then ReLU

    w_ref, b_ref = prefs[idx], prefs[idx + 1]
    out = jnp.dot(h.astype(MATMUL_DTYPE), w_ref[...],
                  preferred_element_type=jnp.float32) + b_ref[...]
    out_ref[...] = out.astype(out_ref.dtype)


# --------------------------------------------------------------------------
# TILED path kernels (one pallas_call per Linear, batch-tiled grid).
# --------------------------------------------------------------------------
def _accumulate_stats(stats_ref, h, i, tb, b_true):
    """Masked sum / sum-of-squares of `h` over real batch rows into a (2, D)
    output block that stays resident across the batch grid axis."""

    @pl.when(i == 0)
    def _():
        stats_ref[...] = jnp.zeros_like(stats_ref)

    rows = i * tb + lax.broadcasted_iota(jnp.int32, (tb, 1), 0)
    valid = (rows < b_true).astype(jnp.float32)
    hv = h * valid
    stats_ref[...] += jnp.concatenate(
        [jnp.sum(hv, axis=0, keepdims=True),
         jnp.sum(hv * hv, axis=0, keepdims=True)],
        axis=0,
    )


def _linear_kernel(b_true, tb, emit_stats, x_ref, w_ref, b_ref, h_ref, *stats_refs):
    """h = x @ W + b (bf16 MXU, f32 acc); optionally accumulate BN stats of h."""
    i = pl.program_id(0)
    h = jnp.dot(x_ref[...].astype(MATMUL_DTYPE), w_ref[...],
                preferred_element_type=jnp.float32) + b_ref[...]
    h_ref[...] = h.astype(h_ref.dtype)
    if emit_stats:
        _accumulate_stats(stats_refs[0], h, i, tb, b_true)


def _bn_relu_linear_kernel(b_true, tb, emit_stats,
                           h_ref, stats_in_ref, g_ref, bt_ref, w_ref, b_ref,
                           out_ref, *stats_refs):
    """Normalize previous layer (folded FMA) -> ReLU -> Linear; optional stats."""
    i = pl.program_id(0)
    inv_b = 1.0 / float(b_true)

    s = stats_in_ref[...]                                 # (2, D_in) sum / sum_sq
    mean = s[0:1, :] * inv_b
    var = jnp.maximum(s[1:2, :] * inv_b - mean * mean, 0.0)
    scale = g_ref[...] * lax.rsqrt(var + EPS)
    shift = bt_ref[...] - mean * scale
    a = jnp.maximum(h_ref[...] * scale + shift, 0.0)

    out = jnp.dot(a.astype(MATMUL_DTYPE), w_ref[...],
                  preferred_element_type=jnp.float32) + b_ref[...]
    out_ref[...] = out.astype(out_ref.dtype)
    if emit_stats:
        _accumulate_stats(stats_refs[0], out, i, tb, b_true)


def _tiled_vmem_limit(tb, d_in, d_out):
    need = (2 * tb * d_in * 4            # input tile, double-buffered
            + 2 * tb * d_out * 4         # output tile, double-buffered
            + 2 * d_in * d_out * 2       # bf16 weights
            + 8 * (d_in + d_out) * 4)    # bias/gamma/beta/stats vectors
    return int(min(max(2 * need, 4 << 20), 48 << 20))


# --------------------------------------------------------------------------
# Host wrapper
# --------------------------------------------------------------------------
@functools.partial(jax.jit, static_argnames=("model_size", "batch_tile", "force_tiled"))
def mlp_forward(x, params, model_size, batch_tile=256, force_tiled=False):
    """params: flat list [w1, b1, g1, beta1, ..., w_out, b_out] (unpadded,
    weights stored as (D_in, D_out))."""
    dims = tuple(int(d) for d in model_size)
    n_lin = len(dims) - 1
    n_hidden = n_lin - 1
    dpad = tuple(_round_up(d, LANE) for d in dims)
    B = x.shape[0]

    # Unpack + pad parameters once (weights -> bf16, lane padded).
    Ws, Bs, Gs, Betas = [], [], [], []
    idx = 0
    for l in range(n_lin):
        w, b = params[idx], params[idx + 1]
        idx += 2
        Ws.append(_pad2d(w, dpad[l], dpad[l + 1]).astype(MATMUL_DTYPE))
        Bs.append(_pad2d(jnp.reshape(b, (1, -1)), 1, dpad[l + 1]))
        if l < n_hidden:
            g, bt = params[idx], params[idx + 1]
            idx += 2
            Gs.append(_pad2d(jnp.reshape(g, (1, -1)), 1, dpad[l + 1], fill=1.0))
            Betas.append(_pad2d(jnp.reshape(bt, (1, -1)), 1, dpad[l + 1]))

    weight_bytes = sum(dpad[i] * dpad[i + 1] for i in range(n_lin)) * 2
    Bp_fused = _round_up(max(B, SUBLANE), SUBLANE)
    fused_need = weight_bytes + 3 * Bp_fused * max(dpad) * 4 + sum(dpad) * 16
    use_fused = (not force_tiled) and fused_need <= (24 << 20)

    if use_fused:
        # -------- single fused kernel, everything VMEM resident --------
        Bp = Bp_fused
        xin = jnp.pad(x.astype(jnp.float32), ((0, Bp - B), (0, dpad[0] - dims[0])))
        inputs = [xin]
        in_specs = [pl.BlockSpec((Bp, dpad[0]), lambda i: (0, 0))]
        for l in range(n_lin):
            inputs += [Ws[l], Bs[l]]
            in_specs += [pl.BlockSpec((dpad[l], dpad[l + 1]), lambda i: (0, 0)),
                         pl.BlockSpec((1, dpad[l + 1]), lambda i: (0, 0))]
            if l < n_hidden:
                inputs += [Gs[l], Betas[l]]
                in_specs += [pl.BlockSpec((1, dpad[l + 1]), lambda i: (0, 0)),
                             pl.BlockSpec((1, dpad[l + 1]), lambda i: (0, 0))]

        flops = sum(2 * Bp * dpad[i] * dpad[i + 1] for i in range(n_lin))
        out = pl.pallas_call(
            functools.partial(_fused_mlp_kernel, B, n_hidden, Bp != B),
            grid=(1,),
            in_specs=in_specs,
            out_specs=pl.BlockSpec((Bp, dpad[-1]), lambda i: (0, 0)),
            out_shape=jax.ShapeDtypeStruct((Bp, dpad[-1]), jnp.float32),
            compiler_params=pltpu.CompilerParams(
                dimension_semantics=("arbitrary",),
                vmem_limit_bytes=int(min(max(4 * fused_need, 8 << 20), 48 << 20))),
            cost_estimate=pl.CostEstimate(
                flops=int(flops),
                transcendentals=int(sum(dpad[1:-1])),
                bytes_accessed=int(Bp * (dpad[0] + dpad[-1]) * 4 + weight_bytes)),
        )(*inputs)
        return out[:B, :dims[-1]]

    # -------- tiled path: one pipelined pallas_call per Linear --------
    TB = _round_up(min(batch_tile, _round_up(B, SUBLANE)), SUBLANE)
    Bp = _round_up(B, TB)
    grid = (Bp // TB,)
    h = jnp.pad(x.astype(jnp.float32), ((0, Bp - B), (0, dpad[0] - dims[0])))

    stats = None
    for l in range(n_lin):
        d_in, d_out = dpad[l], dpad[l + 1]
        emit = l < n_hidden                      # hidden layers feed a BatchNorm

        act_in_spec = pl.BlockSpec((TB, d_in), lambda i: (i, 0))
        w_spec = pl.BlockSpec((d_in, d_out), lambda i: (0, 0))
        vec_in_spec = pl.BlockSpec((1, d_in), lambda i: (0, 0))
        vec_out_spec = pl.BlockSpec((1, d_out), lambda i: (0, 0))

        out_shape = [jax.ShapeDtypeStruct((Bp, d_out), jnp.float32)]
        out_specs = [pl.BlockSpec((TB, d_out), lambda i: (i, 0))]
        if emit:
            out_shape.append(jax.ShapeDtypeStruct((2, d_out), jnp.float32))
            out_specs.append(pl.BlockSpec((2, d_out), lambda i: (0, 0)))

        if l == 0:
            kern = functools.partial(_linear_kernel, B, TB, emit)
            inputs = (h, Ws[l], Bs[l])
            in_specs = [act_in_spec, w_spec, vec_out_spec]
            transcendentals = 0
        else:
            kern = functools.partial(_bn_relu_linear_kernel, B, TB, emit)
            inputs = (h, stats, Gs[l - 1], Betas[l - 1], Ws[l], Bs[l])
            in_specs = [act_in_spec,
                        pl.BlockSpec((2, d_in), lambda i: (0, 0)),
                        vec_in_spec, vec_in_spec, w_spec, vec_out_spec]
            transcendentals = d_in * grid[0]

        bytes_accessed = (Bp * d_in * 4 + Bp * d_out * 4
                          + d_in * d_out * 2 + 32 * (d_in + d_out))
        semantics = ("arbitrary",) if emit else ("parallel",)

        result = pl.pallas_call(
            kern,
            grid=grid,
            in_specs=in_specs,
            out_specs=out_specs,
            out_shape=out_shape,
            compiler_params=pltpu.CompilerParams(
                dimension_semantics=semantics,
                vmem_limit_bytes=_tiled_vmem_limit(TB, d_in, d_out)),
            cost_estimate=pl.CostEstimate(
                flops=2 * Bp * d_in * d_out,
                transcendentals=transcendentals,
                bytes_accessed=bytes_accessed),
        )(*inputs)

        if emit:
            h, stats = result
        else:
            h = result[0]

    # Dropout(p=0) is the identity. Slice away batch / lane padding.
    return h[:B, :dims[-1]]


# --------------------------------------------------------------------------
# Parameter init (PyTorch defaults) and pure-JAX reference.
# --------------------------------------------------------------------------
def init_params(key, model_size):
    params = []
    sizes = list(zip(model_size[:-1], model_size[1:]))
    for li, (d_in, d_out) in enumerate(sizes):
        key, kw, kb = jax.random.split(key, 3)
        bound = 1.0 / (d_in ** 0.5)
        w = jax.random.uniform(kw, (d_in, d_out), jnp.float32, -bound, bound)
        b = jax.random.uniform(kb, (1, d_out), jnp.float32, -bound, bound)
        params += [w, b]
        if li < len(sizes) - 1:  # hidden layer: BatchNorm gamma=1, beta=0
            params += [jnp.ones((1, d_out), jnp.float32),
                       jnp.zeros((1, d_out), jnp.float32)]
    return params


def mlp_reference(x, params, model_size, matmul_dtype=jnp.float32):
    """Pure-JAX reference (PyTorch training-mode BN semantics)."""
    n_hidden = len(model_size) - 2
    h = x.astype(jnp.float32)
    idx = 0
    for _ in range(n_hidden):
        w, b, g, beta = params[idx], params[idx + 1], params[idx + 2], params[idx + 3]
        idx += 4
        h = jnp.dot(h.astype(matmul_dtype), w.astype(matmul_dtype),
                    preferred_element_type=jnp.float32) + b
        mean = jnp.mean(h, axis=0, keepdims=True)
        var = jnp.mean((h - mean) ** 2, axis=0, keepdims=True)
        h = (h - mean) * lax.rsqrt(var + EPS) * g + beta
        h = jnp.maximum(h, 0.0)
    w, b = params[idx], params[idx + 1]
    return jnp.dot(h.astype(matmul_dtype), w.astype(matmul_dtype),
                   preferred_element_type=jnp.float32) + b


# TODO(synk): Grid_Based_network.grid_to_theta (sort-based peak picking) is not
# part of MLP.forward and is left out of the Pallas translation.

if __name__ == "__main__":
    model_size = (32, 64, 64, 16)   # in -> hidden -> hidden -> out
    B = 120                         # deliberately NOT a multiple of 8 / batch tile

    key = jax.random.PRNGKey(0)
    key, kx = jax.random.split(key)
    x = jax.random.normal(kx, (B, model_size[0]), dtype=jnp.float32)
    params = init_params(key, model_size)

    ref = mlp_reference(x, params, model_size, matmul_dtype=MATMUL_DTYPE)

    # Fused single-kernel path (auto-selected for small problems).
    out_fused = jax.block_until_ready(
        mlp_forward(x, params, model_size=model_size))
    assert out_fused.shape == (B, model_size[-1])
    err_f = float(jnp.max(jnp.abs(out_fused - ref)))
    assert jnp.allclose(out_fused, ref, atol=2e-2, rtol=2e-2), (
        f"fused path mismatch, max abs err = {err_f}")

    # Layer-tiled pipelined path (used for large batches) exercised explicitly.
    out_tiled = jax.block_until_ready(
        mlp_forward(x, params, model_size=model_size,
                    batch_tile=32, force_tiled=True))
    err_t = float(jnp.max(jnp.abs(out_tiled - ref)))
    assert jnp.allclose(out_tiled, ref, atol=2e-2, rtol=2e-2), (
        f"tiled path mismatch, max abs err = {err_t}")

    print("KERNEL_OK")
</pallas_src>

<mosaic_0001>
module attributes {stable_mosaic.version = 11 : i64} {
  func.func @_fused_mlp_kernel(%arg0: i32, %arg1: memref<120x128xf32, #tpu.memory_space<vmem>>, %arg2: memref<128x128xbf16, #tpu.memory_space<vmem>>, %arg3: memref<1x128xf32, #tpu.memory_space<vmem>>, %arg4: memref<1x128xf32, #tpu.memory_space<vmem>>, %arg5: memref<1x128xf32, #tpu.memory_space<vmem>>, %arg6: memref<128x128xbf16, #tpu.memory_space<vmem>>, %arg7: memref<1x128xf32, #tpu.memory_space<vmem>>, %arg8: memref<1x128xf32, #tpu.memory_space<vmem>>, %arg9: memref<1x128xf32, #tpu.memory_space<vmem>>, %arg10: memref<128x128xbf16, #tpu.memory_space<vmem>>, %arg11: memref<1x128xf32, #tpu.memory_space<vmem>>, %arg12: memref<120x128xf32, #tpu.memory_space<vmem>>) attributes {dimension_semantics = [#tpu.dimension_semantics<arbitrary>], iteration_bounds = array<i64: 1>, scalar_prefetch = 0 : i64, scratch_operands = 0 : i64, tpu.core_type = #tpu.core_type<tc>, window_params = [{pipeline_mode = #tpu.pipeline_mode<synchronous>, transform_indices = @transform_0, window_bounds = array<i64: 120, 128>}, {pipeline_mode = #tpu.pipeline_mode<synchronous>, transform_indices = @transform_1, window_bounds = array<i64: 128, 128>}, {pipeline_mode = #tpu.pipeline_mode<synchronous>, transform_indices = @transform_2, window_bounds = array<i64: 1, 128>}, {pipeline_mode = #tpu.pipeline_mode<synchronous>, transform_indices = @transform_3, window_bounds = array<i64: 1, 128>}, {pipeline_mode = #tpu.pipeline_mode<synchronous>, transform_indices = @transform_4, window_bounds = array<i64: 1, 128>}, {pipeline_mode = #tpu.pipeline_mode<synchronous>, transform_indices = @transform_5, window_bounds = array<i64: 128, 128>}, {pipeline_mode = #tpu.pipeline_mode<synchronous>, transform_indices = @transform_6, window_bounds = array<i64: 1, 128>}, {pipeline_mode = #tpu.pipeline_mode<synchronous>, transform_indices = @transform_7, window_bounds = array<i64: 1, 128>}, {pipeline_mode = #tpu.pipeline_mode<synchronous>, transform_indices = @transform_8, window_bounds = array<i64: 1, 128>}, {pipeline_mode = #tpu.pipeline_mode<synchronous>, transform_indices = @transform_9, window_bounds = array<i64: 128, 128>}, {pipeline_mode = #tpu.pipeline_mode<synchronous>, transform_indices = @transform_10, window_bounds = array<i64: 1, 128>}, {pipeline_mode = #tpu.pipeline_mode<synchronous>, transform_indices = @transform_11, window_bounds = array<i64: 120, 128>}]} {
    %c0 = arith.constant 0 : index
    %c0_0 = arith.constant 0 : index
    %0 = vector.load %arg1[%c0, %c0_0] : memref<120x128xf32, #tpu.memory_space<vmem>>, vector<120x128xf32>
    %1 = arith.truncf %0 : vector<120x128xf32> to vector<120x128xbf16>
    %c0_1 = arith.constant 0 : index
    %c0_2 = arith.constant 0 : index
    %2 = vector.load %arg2[%c0_1, %c0_2] : memref<128x128xbf16, #tpu.memory_space<vmem>>, vector<128x128xbf16>
    %cst = arith.constant dense<0.000000e+00> : vector<120x128xf32>
    %3 = tpu.matmul %1, %2, %cst {dimension_numbers = #tpu.dot_dimension_numbers<[1], [0], [0], [1], [0, 0, 1, 1], [], []>} : vector<120x128xbf16>, vector<128x128xbf16>, vector<120x128xf32> -> vector<120x128xf32>
    %c0_3 = arith.constant 0 : index
    %c0_4 = arith.constant 0 : index
    %4 = vector.load %arg3[%c0_3, %c0_4] : memref<1x128xf32, #tpu.memory_space<vmem>>, vector<1x128xf32>
    %5 = vector.broadcast %4 : vector<1x128xf32> to vector<120x128xf32>
    %6 = arith.addf %3, %5 : vector<120x128xf32>
    %cst_5 = arith.constant dense<0.000000e+00> : vector<128xf32>
    %7 = vector.multi_reduction <add>, %6, %cst_5 [0] : vector<120x128xf32> to vector<128xf32>
    %8 = vector.shape_cast %7 : vector<128xf32> to vector<1x128xf32>
    %cst_6 = arith.constant 0.00833333377 : f32
    %9 = vector.broadcast %cst_6 : f32 to vector<1x128xf32>
    %10 = arith.mulf %8, %9 : vector<1x128xf32>
    %11 = arith.mulf %6, %6 : vector<120x128xf32>
    %cst_7 = arith.constant dense<0.000000e+00> : vector<128xf32>
    %12 = vector.multi_reduction <add>, %11, %cst_7 [0] : vector<120x128xf32> to vector<128xf32>
    %13 = vector.shape_cast %12 : vector<128xf32> to vector<1x128xf32>
    %cst_8 = arith.constant 0.00833333377 : f32
    %14 = vector.broadcast %cst_8 : f32 to vector<1x128xf32>
    %15 = arith.mulf %13, %14 : vector<1x128xf32>
    %16 = arith.mulf %10, %10 : vector<1x128xf32>
    %17 = arith.subf %15, %16 : vector<1x128xf32>
    %cst_9 = arith.constant 0.000000e+00 : f32
    %18 = vector.broadcast %cst_9 : f32 to vector<1x128xf32>
    %19 = arith.maximumf %17, %18 : vector<1x128xf32>
    %c0_10 = arith.constant 0 : index
    %c0_11 = arith.constant 0 : index
    %20 = vector.load %arg4[%c0_10, %c0_11] : memref<1x128xf32, #tpu.memory_space<vmem>>, vector<1x128xf32>
    %cst_12 = arith.constant 9.99999974E-6 : f32
    %21 = vector.broadcast %cst_12 : f32 to vector<1x128xf32>
    %22 = arith.addf %19, %21 : vector<1x128xf32>
    %23 = math.rsqrt %22 : vector<1x128xf32>
    %24 = arith.mulf %20, %23 : vector<1x128xf32>
    %c0_13 = arith.constant 0 : index
    %c0_14 = arith.constant 0 : index
    %25 = vector.load %arg5[%c0_13, %c0_14] : memref<1x128xf32, #tpu.memory_space<vmem>>, vector<1x128xf32>
    %26 = arith.mulf %10, %24 : vector<1x128xf32>
    %27 = arith.subf %25, %26 : vector<1x128xf32>
    %28 = vector.broadcast %24 : vector<1x128xf32> to vector<120x128xf32>
    %29 = arith.mulf %6, %28 : vector<120x128xf32>
    %30 = vector.broadcast %27 : vector<1x128xf32> to vector<120x128xf32>
    %31 = arith.addf %29, %30 : vector<120x128xf32>
    %cst_15 = arith.constant 0.000000e+00 : f32
    %32 = vector.broadcast %cst_15 : f32 to vector<120x128xf32>
    %33 = arith.maximumf %31, %32 : vector<120x128xf32>
    %34 = arith.truncf %33 : vector<120x128xf32> to vector<120x128xbf16>
    %c0_16 = arith.constant 0 : index
    %c0_17 = arith.constant 0 : index
    %35 = vector.load %arg6[%c0_16, %c0_17] : memref<128x128xbf16, #tpu.memory_space<vmem>>, vector<128x128xbf16>
    %cst_18 = arith.constant dense<0.000000e+00> : vector<120x128xf32>
    %36 = tpu.matmul %34, %35, %cst_18 {dimension_numbers = #tpu.dot_dimension_numbers<[1], [0], [0], [1], [0, 0, 1, 1], [], []>} : vector<120x128xbf16>, vector<128x128xbf16>, vector<120x128xf32> -> vector<120x128xf32>
    %c0_19 = arith.constant 0 : index
    %c0_20 = arith.constant 0 : index
    %37 = vector.load %arg7[%c0_19, %c0_20] : memref<1x128xf32, #tpu.memory_space<vmem>>, vector<1x128xf32>
    %38 = vector.broadcast %37 : vector<1x128xf32> to vector<120x128xf32>
    %39 = arith.addf %36, %38 : vector<120x128xf32>
    %cst_21 = arith.constant dense<0.000000e+00> : vector<128xf32>
    %40 = vector.multi_reduction <add>, %39, %cst_21 [0] : vector<120x128xf32> to vector<128xf32>
    %41 = vector.shape_cast %40 : vector<128xf32> to vector<1x128xf32>
    %cst_22 = arith.constant 0.00833333377 : f32
    %42 = vector.broadcast %cst_22 : f32 to vector<1x128xf32>
    %43 = arith.mulf %41, %42 : vector<1x128xf32>
    %44 = arith.mulf %39, %39 : vector<120x128xf32>
    %cst_23 = arith.constant dense<0.000000e+00> : vector<128xf32>
    %45 = vector.multi_reduction <add>, %44, %cst_23 [0] : vector<120x128xf32> to vector<128xf32>
    %46 = vector.shape_cast %45 : vector<128xf32> to vector<1x128xf32>
    %cst_24 = arith.constant 0.00833333377 : f32
    %47 = vector.broadcast %cst_24 : f32 to vector<1x128xf32>
    %48 = arith.mulf %46, %47 : vector<1x128xf32>
    %49 = arith.mulf %43, %43 : vector<1x128xf32>
    %50 = arith.subf %48, %49 : vector<1x128xf32>
    %cst_25 = arith.constant 0.000000e+00 : f32
    %51 = vector.broadcast %cst_25 : f32 to vector<1x128xf32>
    %52 = arith.maximumf %50, %51 : vector<1x128xf32>
    %c0_26 = arith.constant 0 : index
    %c0_27 = arith.constant 0 : index
    %53 = vector.load %arg8[%c0_26, %c0_27] : memref<1x128xf32, #tpu.memory_space<vmem>>, vector<1x128xf32>
    %cst_28 = arith.constant 9.99999974E-6 : f32
    %54 = vector.broadcast %cst_28 : f32 to vector<1x128xf32>
    %55 = arith.addf %52, %54 : vector<1x128xf32>
    %56 = math.rsqrt %55 : vector<1x128xf32>
    %57 = arith.mulf %53, %56 : vector<1x128xf32>
    %c0_29 = arith.constant 0 : index
    %c0_30 = arith.constant 0 : index
    %58 = vector.load %arg9[%c0_29, %c0_30] : memref<1x128xf32, #tpu.memory_space<vmem>>, vector<1x128xf32>
    %59 = arith.mulf %43, %57 : vector<1x128xf32>
    %60 = arith.subf %58, %59 : vector<1x128xf32>
    %61 = vector.broadcast %57 : vector<1x128xf32> to vector<120x128xf32>
    %62 = arith.mulf %39, %61 : vector<120x128xf32>
    %63 = vector.broadcast %60 : vector<1x128xf32> to vector<120x128xf32>
    %64 = arith.addf %62, %63 : vector<120x128xf32>
    %cst_31 = arith.constant 0.000000e+00 : f32
    %65 = vector.broadcast %cst_31 : f32 to vector<120x128xf32>
    %66 = arith.maximumf %64, %65 : vector<120x128xf32>
    %67 = arith.truncf %66 : vector<120x128xf32> to vector<120x128xbf16>
    %c0_32 = arith.constant 0 : index
    %c0_33 = arith.constant 0 : index
    %68 = vector.load %arg10[%c0_32, %c0_33] : memref<128x128xbf16, #tpu.memory_space<vmem>>, vector<128x128xbf16>
    %cst_34 = arith.constant dense<0.000000e+00> : vector<120x128xf32>
    %69 = tpu.matmul %67, %68, %cst_34 {dimension_numbers = #tpu.dot_dimension_numbers<[1], [0], [0], [1], [0, 0, 1, 1], [], []>} : vector<120x128xbf16>, vector<128x128xbf16>, vector<120x128xf32> -> vector<120x128xf32>
    %c0_35 = arith.constant 0 : index
    %c0_36 = arith.constant 0 : index
    %70 = vector.load %arg11[%c0_35, %c0_36] : memref<1x128xf32, #tpu.memory_space<vmem>>, vector<1x128xf32>
    %71 = vector.broadcast %70 : vector<1x128xf32> to vector<120x128xf32>
    %72 = arith.addf %69, %71 : vector<120x128xf32>
    %c0_37 = arith.constant 0 : index
    %c0_38 = arith.constant 0 : index
    %73 = vector.load %arg12[%c0_37, %c0_38] : memref<120x128xf32, #tpu.memory_space<vmem>>, vector<120x128xf32>
    tpu.vector_store %arg12[%c0_37, %c0_38], %72 {strides = array<i32>} : memref<120x128xf32, #tpu.memory_space<vmem>>, vector<120x128xf32>,
    return
  }
  func.func @transform_0(%arg0: i32) -> (i32, i32) {
    %c0_i32 = arith.constant 0 : i32
    %c0_i32_0 = arith.constant 0 : i32
    %c0_i32_1 = arith.constant 0 : i32
    return %c0_i32, %c0_i32_0 : i32, i32
  }
  func.func @transform_1(%arg0: i32) -> (i32, i32) {
    %c0_i32 = arith.constant 0 : i32
    %c0_i32_0 = arith.constant 0 : i32
    %c0_i32_1 = arith.constant 0 : i32
    return %c0_i32, %c0_i32_0 : i32, i32
  }
  func.func @transform_2(%arg0: i32) -> (i32, i32) {
    %c0_i32 = arith.constant 0 : i32
    %c0_i32_0 = arith.constant 0 : i32
    %c0_i32_1 = arith.constant 0 : i32
    return %c0_i32, %c0_i32_0 : i32, i32
  }
  func.func @transform_3(%arg0: i32) -> (i32, i32) {
    %c0_i32 = arith.constant 0 : i32
    %c0_i32_0 = arith.constant 0 : i32
    %c0_i32_1 = arith.constant 0 : i32
    return %c0_i32, %c0_i32_0 : i32, i32
  }
  func.func @transform_4(%arg0: i32) -> (i32, i32) {
    %c0_i32 = arith.constant 0 : i32
    %c0_i32_0 = arith.constant 0 : i32
    %c0_i32_1 = arith.constant 0 : i32
    return %c0_i32, %c0_i32_0 : i32, i32
  }
  func.func @transform_5(%arg0: i32) -> (i32, i32) {
    %c0_i32 = arith.constant 0 : i32
    %c0_i32_0 = arith.constant 0 : i32
    %c0_i32_1 = arith.constant 0 : i32
    return %c0_i32, %c0_i32_0 : i32, i32
  }
  func.func @transform_6(%arg0: i32) -> (i32, i32) {
    %c0_i32 = arith.constant 0 : i32
    %c0_i32_0 = arith.constant 0 : i32
    %c0_i32_1 = arith.constant 0 : i32
    return %c0_i32, %c0_i32_0 : i32, i32
  }
  func.func @transform_7(%arg0: i32) -> (i32, i32) {
    %c0_i32 = arith.constant 0 : i32
    %c0_i32_0 = arith.constant 0 : i32
    %c0_i32_1 = arith.constant 0 : i32
    return %c0_i32, %c0_i32_0 : i32, i32
  }
  func.func @transform_8(%arg0: i32) -> (i32, i32) {
    %c0_i32 = arith.constant 0 : i32
    %c0_i32_0 = arith.constant 0 : i32
    %c0_i32_1 = arith.constant 0 : i32
    return %c0_i32, %c0_i32_0 : i32, i32
  }
  func.func @transform_9(%arg0: i32) -> (i32, i32) {
    %c0_i32 = arith.constant 0 : i32
    %c0_i32_0 = arith.constant 0 : i32
    %c0_i32_1 = arith.constant 0 : i32
    return %c0_i32, %c0_i32_0 : i32, i32
  }
  func.func @transform_10(%arg0: i32) -> (i32, i32) {
    %c0_i32 = arith.constant 0 : i32
    %c0_i32_0 = arith.constant 0 : i32
    %c0_i32_1 = arith.constant 0 : i32
    return %c0_i32, %c0_i32_0 : i32, i32
  }
  func.func @transform_11(%arg0: i32) -> (i32, i32) {
    %c0_i32 = arith.constant 0 : i32
    %c0_i32_0 = arith.constant 0 : i32
    %c0_i32_1 = arith.constant 0 : i32
    return %c0_i32, %c0_i32_0 : i32, i32
  }
}

</mosaic_0001>

<bundles_post_ra>
// kernel: mlp_forward.1
= control target key start
LH: loop header
LB: loop body
LE: loop exit
PB: predicated region body
PF: predicated region fallthrough
CT: control target
= control target key end

     0   :  { %s1494_s1 = inlined_call_operand.vmem [shape: bf16[128,128], index: 1, kind: input, shape index: {}]   ;;  %s1495_s0 = inlined_call_operand.vmem [shape: f32[120,128], index: 0, kind: input, shape index: {}]   ;;  %s1496_s5 = inlined_call_operand.vmem [shape: bf16[128,128], index: 5, kind: input, shape index: {}]   ;;  %s1497_s2 = inlined_call_operand.vmem [shape: f32[1,128], index: 2, kind: input, shape index: {}]   ;;  %s1498_s3 = inlined_call_operand.vmem [shape: f32[1,128], index: 3, kind: input, shape index: {}]   ;;  %s1499_s4 = inlined_call_operand.vmem [shape: f32[1,128], index: 4, kind: input, shape index: {}]   ;;  %s1500_s9 = inlined_call_operand.vmem [shape: bf16[128,128], index: 9, kind: input, shape index: {}]   ;;  %s1501_s6 = inlined_call_operand.vmem [shape: f32[1,128], index: 6, kind: input, shape index: {}]   ;;  %s1502_s7 = inlined_call_operand.vmem [shape: f32[1,128], index: 7, kind: input, shape index: {}]   ;;  %s1503_s8 = inlined_call_operand.vmem [shape: f32[1,128], index: 8, kind: input, shape index: {}]   ;;  %s1504_s10 = inlined_call_operand.vmem [shape: f32[1,128], index: 10, kind: input, shape index: {}]   ;;  %s1505_s11 = inlined_call_operand.vmem [shape: f32[120,128], index: 11, kind: output, shape index: {}]  }
   0x1   :  { %v1033_v0 = vld [vmem:[%s1494_s1 + $0x38] sm:$0xff]   ;;  %v1034_v1 = vld [vmem:[%s1494_s1 + $0x30] sm:$0xff]   ;;  %v1035_v2 = vld [vmem:[%s1494_s1 + $0x28] sm:$0xff]  }
   0x2   :  { %921 = vmatprep.subr.bf16.mxu0 %v1033_v0  ;;  %v1036_v3 = vld [vmem:[%s1494_s1 + $0x20] sm:$0xff]   ;;  %v40_v5 = vld [vmem:[%s1495_s0 + $0x8] sm:$0xff]  ;;  %v1037_v7 = vld [vmem:[%s1494_s1 + $0x18] sm:$0xff]  }
   0x3   :  { %922 = vmatpush3.bf16.msra.mxu0 %v1033_v0  ;;  %v39_v4 = vld [vmem:[%s1495_s0] sm:$0xff]  ;;  %v1038_v8 = vld [vmem:[%s1494_s1 + $0x10] sm:$0xff]   ;;  %v1039_v9 = vld [vmem:[%s1494_s1 + $0x8] sm:$0xff]  }
   0x4   :  { %923 = vmatprep.subr.bf16.mxu0 %v1034_v1  ;;  %v54_v6 = vpack.c.bf16 %v40_v5, %v39_v4  ;;  %v1040_v10 = vld [vmem:[%s1494_s1] sm:$0xff]   ;;  %v41_v11 = vld [vmem:[%s1495_s0 + $0x10] sm:$0xff]  ;;  %v42_v12 = vld [vmem:[%s1495_s0 + $0x18] sm:$0xff] }
   0x5   :  { %v43_v13 = vld [vmem:[%s1495_s0 + $0x20] sm:$0xff]  ;;  %v44_v14 = vld [vmem:[%s1495_s0 + $0x28] sm:$0xff]  ;;  %v55_v15 = vpack.c.bf16 %v42_v12, %v41_v11  ;;  %v45_v17 = vld [vmem:[%s1495_s0 + $0x30] sm:$0xff] }
   0x6   :  { %937 = vmatprep.mubr.bf16.mxu0 %v54_v6  ;;  %v56_v16 = vpack.c.bf16 %v44_v14, %v43_v13  ;;  %v46_v18 = vld [vmem:[%s1495_s0 + $0x38] sm:$0xff]  ;;  %v47_v19 = vld [vmem:[%s1495_s0 + $0x40] sm:$0xff]  ;;  %v48_v20 = vld [vmem:[%s1495_s0 + $0x48] sm:$0xff] }
   0x7   :  { %924 = vmatpush3.bf16.msra.mxu0 %v1034_v1  ;;  %v57_v21 = vpack.c.bf16 %v46_v18, %v45_v17  ;;  %v58_v22 = vpack.c.bf16 %v48_v20, %v47_v19  ;;  %v49_v23 = vld [vmem:[%s1495_s0 + $0x50] sm:$0xff]  ;;  %v50_v24 = vld [vmem:[%s1495_s0 + $0x58] sm:$0xff]  ;;  %v51_v25 = vld [vmem:[%s1495_s0 + $0x60] sm:$0xff] }
   0x8   :  { %925 = vmatprep.subr.bf16.mxu0 %v1035_v2  ;;  %v52_v26 = vld [vmem:[%s1495_s0 + $0x68] sm:$0xff]  ;;  %v59_v27 = vpack.c.bf16 %v50_v24, %v49_v23  ;;  %v53_v29 = vld [vmem:[%s1495_s0 + $0x70] sm:$0xff]  ;;  %v1041_v31 = vld [vmem:[%s1496_s5 + $0x38] sm:$0xff]  }
   0x9   :  { %v60_v28 = vpack.c.bf16 %v52_v26, %v51_v25  ;;  %v61_v30 = vpack.c.bf16 %v53_v29, %v53_v29  ;;  %953 = vmatprep.subr.bf16.mxu1 %v1041_v31  ;;  %v1042_v32 = vld [vmem:[%s1496_s5 + $0x30] sm:$0xff]   ;;  %v1043_v33 = vld [vmem:[%s1496_s5 + $0x28] sm:$0xff]   ;;  %v1044_v34 = vld [vmem:[%s1496_s5 + $0x20] sm:$0xff]  }
   0xa   :  { %954 = vmatpush3.bf16.msra.mxu1 %v1041_v31  ;;  %v1045_v35 = vld [vmem:[%s1496_s5 + $0x18] sm:$0xff]   ;;  %v1046_v36 = vld [vmem:[%s1496_s5 + $0x10] sm:$0xff]   ;;  %v1047_v37 = vld [vmem:[%s1496_s5 + $0x8] sm:$0xff]  }
   0xb   :  { %926 = vmatpush3.bf16.msra.mxu0 %v1035_v2  ;;  %955 = vmatprep.subr.bf16.mxu1 %v1042_v32  ;;  %v1048_v38 = vld [vmem:[%s1496_s5] sm:$0xff]  }
   0xc   :  { %927 = vmatprep.subr.bf16.mxu0 %v1036_v3  ;;  %v1217_v41 = vld [vmem:[%s1497_s2] ss:$0 sm:$0xff] }
   0xe   :  { %956 = vmatpush3.bf16.msra.mxu1 %v1042_v32 }
   0xf   :  { %928 = vmatpush3.bf16.msra.mxu0 %v1036_v3  ;;  %957 = vmatprep.subr.bf16.mxu1 %v1043_v33 }
  0x10   :  { %929 = vmatprep.subr.bf16.mxu0 %v1037_v7 }
  0x12   :  { %958 = vmatpush3.bf16.msra.mxu1 %v1043_v33 }
  0x13   :  { %930 = vmatpush3.bf16.msra.mxu0 %v1037_v7  ;;  %959 = vmatprep.subr.bf16.mxu1 %v1044_v34 }
  0x14   :  { %931 = vmatprep.subr.bf16.mxu0 %v1038_v8 }
  0x16   :  { %960 = vmatpush3.bf16.msra.mxu1 %v1044_v34 }
  0x17   :  { %932 = vmatpush3.bf16.msra.mxu0 %v1038_v8  ;;  %961 = vmatprep.subr.bf16.mxu1 %v1045_v35 }
  0x18   :  { %933 = vmatprep.subr.bf16.mxu0 %v1039_v9 }
  0x1a   :  { %962 = vmatpush3.bf16.msra.mxu1 %v1045_v35 }
  0x1b   :  { %934 = vmatpush3.bf16.msra.mxu0 %v1039_v9  ;;  %963 = vmatprep.subr.bf16.mxu1 %v1046_v36 }
  0x1c   :  { %935 = vmatprep.subr.bf16.mxu0 %v1040_v10 }
  0x1e   :  { %964 = vmatpush3.bf16.msra.mxu1 %v1046_v36 }
  0x1f   :  { %936 = vmatpush3.bf16.msra.mxu0 %v1040_v10  ;;  %965 = vmatprep.subr.bf16.mxu1 %v1047_v37 }
  0x22   :  { %938 = vmatmul.mubr.bf16.vlgmr.msra.gmra.mxu0 %v55_v15  ;;  %966 = vmatpush3.bf16.msra.mxu1 %v1047_v37 }
  0x23   :  { %941 = vmatprep.mubr.bf16.mxu0 %v56_v16  ;;  %967 = vmatprep.subr.bf16.mxu1 %v1048_v38 }
  0x26   :  { %968 = vmatpush3.bf16.msra.mxu1 %v1048_v38 }
  0x2a   :  { %942 = vmatmul.mubr.bf16.gmra.mxu0 %v57_v21 }
  0x2b   :  { %945 = vmatprep.mubr.bf16.mxu0 %v58_v22 }
  0x32   :  { %946 = vmatmul.mubr.bf16.gmra.mxu0 %v59_v27 }
  0x33   :  { %949 = vmatprep.mubr.bf16.mxu0 %v60_v28 }
  0x3a   :  { %950 = vmatmul.mubr.bf16.gmra.mxu0 %v61_v30 }
  0xe2   :  { %v939_v39 = vpop.f32.mrf.mxu0 }
  0xe3   :  { %v1223_v45 = vadd.f32 %v939_v39, %v1217_v41 }
  0xe4   :  { %v167_v40 = vpop.f32.mrf.mxu0 }
  0xe5   :  { %v1220_v43 = vadd.f32 %v1217_v41, %v167_v40  ;;  %v252_v53 = vmul.f32 %v1223_v45, %v1223_v45 }
  0xe6   :  { %v940_v42 = vpop.f32.mrf.mxu0 }
  0xe7   :  { %v250_v48 = vmul.f32 %v1220_v43, %v1220_v43  ;;  %v1231_v49 = vadd.f32 %v940_v42, %v1217_v41 }
  0xe8   :  { %v170_v44 = vpop.f32.mrf.mxu0 }
  0xe9   :  { %v1226_v46 = vadd.f32 %v1217_v41, %v170_v44  ;;  %v253_v58 = vmul.f32 %v1231_v49, %v1231_v49 }
  0xea   :  { %v943_v47 = vpop.f32.mrf.mxu0 }
  0xeb   :  { %v229_v50 = vadd.f32 %v1226_v46, %v1220_v43  ;;  %v251_v51 = vmul.f32 %v1226_v46, %v1226_v46  ;;  %v1247_v61 = vadd.f32 %v943_v47, %v1217_v41 }
  0xec   :  { %v183_v52 = vpop.f32.mrf.mxu0 }
  0xed   :  { %v230_v54 = vadd.f32 %v229_v50, %v1223_v45  ;;  %v265_v55 = vadd.f32 %v251_v51, %v250_v48  ;;  %v1241_v56 = vadd.f32 %v1217_v41, %v183_v52  ;;  %v256_v9 = vmul.f32 %v1247_v61, %v1247_v61 }
  0xee   :  { %v944_v57 = vpop.f32.mrf.mxu0 }
  0xef   :  { %v266_v59 = vadd.f32 %v265_v55, %v252_v53  ;;  %v231_v60 = vadd.f32 %v230_v54, %v1231_v49  ;;  %v254_v0 = vmul.f32 %v1241_v56, %v1241_v56  ;;  %v1256_v5 = vadd.f32 %v944_v57, %v1217_v41 }
  0xf0   :  { %v186_v62 = vpop.f32.mrf.mxu0 }
  0xf1   :  { %v232_v63 = vadd.f32 %v231_v60, %v1241_v56  ;;  %v267_v1 = vadd.f32 %v266_v59, %v253_v58  ;;  %v1253_v2 = vadd.f32 %v1217_v41, %v186_v62  ;;  %v257_v14 = vmul.f32 %v1256_v5, %v1256_v5 }
  0xf2   :  { %v947_v3 = vpop.f32.mrf.mxu0 }
  0xf3   :  { %v268_v4 = vadd.f32 %v267_v1, %v254_v0  ;;  %v233_v6 = vadd.f32 %v232_v63, %v1253_v2  ;;  %v255_v7 = vmul.f32 %v1253_v2, %v1253_v2  ;;  %v1271_v17 = vadd.f32 %v947_v3, %v1217_v41 }
  0xf4   :  { %v199_v8 = vpop.f32.mrf.mxu0 }
  0xf5   :  { %v234_v10 = vadd.f32 %v233_v6, %v1247_v61  ;;  %v269_v11 = vadd.f32 %v268_v4, %v255_v7  ;;  %v1265_v12 = vadd.f32 %v1217_v41, %v199_v8  ;;  %v260_v29 = vmul.f32 %v1271_v17, %v1271_v17 }
  0xf6   :  { %v948_v13 = vpop.f32.mrf.mxu0 }
  0xf7   :  { %v270_v15 = vadd.f32 %v269_v11, %v256_v9  ;;  %v235_v16 = vadd.f32 %v234_v10, %v1256_v5  ;;  %v258_v20 = vmul.f32 %v1265_v12, %v1265_v12  ;;  %v1280_v25 = vadd.f32 %v948_v13, %v1217_v41 }
  0xf8   :  { %v202_v18 = vpop.f32.mrf.mxu0  ;;  %v297_v13 = vlaneseq }
  0xf9   :  { %v236_v19 = vadd.f32 %v235_v16, %v1265_v12  ;;  %v271_v21 = vadd.f32 %v270_v15, %v257_v14  ;;  %v1277_v22 = vadd.f32 %v1217_v41, %v202_v18  ;;  %v261_v34 = vmul.f32 %v1280_v25, %v1280_v25  ;;  %v289_v15 = vld [vmem:[%s1498_s3] sm:$0x1] }
  0xfa   :  { %v951_v23 = vpop.f32.mrf.mxu0  ;;  %v298_v14 = vshrl.u32 %v297_v13, 7 }
  0xfb   :  { %v272_v24 = vadd.f32 %v271_v21, %v258_v20  ;;  %v237_v26 = vadd.f32 %v236_v19, %v1277_v22  ;;  %v259_v27 = vmul.f32 %v1277_v22, %v1277_v22  ;;  %v1295_v37 = vadd.f32 %v951_v23, %v1217_v41  ;;  %v293_v20 = vld [vmem:[%s1499_s4] sm:$0x1] }
  0xfc   :  { %v215_v28 = vpop.f32.mrf.mxu0  ;;  %v1307_v16 = vsub.s32 0, %v298_v14  ;;  %v1049_v14 = vld [vmem:[%s1500_s9 + $0x38] sm:$0xff]  }
  0xfd   :  { %v238_v30 = vadd.f32 %v237_v26, %v1271_v17  ;;  %v273_v31 = vadd.f32 %v272_v24, %v259_v27  ;;  %v1289_v32 = vadd.f32 %v1217_v41, %v215_v28  ;;  %v264_v51 = vmul.f32 %v1295_v37, %v1295_v37  ;;  %985 = vmatprep.subr.bf16.mxu0 %v1049_v14 }
  0xfe   :  { %v952_v33 = vpop.f32.mrf.mxu0  ;;  %1017 = vmatprep.subr.bf16.mxu1 %v1049_v14  ;;  %986 = vmatpush3.bf16.msra.mxu0 %v1049_v14 }
  0xff   :  { %v274_v35 = vadd.f32 %v273_v31, %v260_v29  ;;  %v239_v36 = vadd.f32 %v238_v30, %v1280_v25  ;;  %v262_v40 = vmul.f32 %v1289_v32, %v1289_v32 }
 0x100   :  { %v218_v38 = vpop.f32.mrf.mxu0 }
 0x101   :  { %v240_v39 = vadd.f32 %v239_v36, %v1289_v32  ;;  %v275_v42 = vadd.f32 %v274_v35, %v261_v34  ;;  %v219_v44 = vadd.f32 %v1217_v41, %v218_v38 }
 0x103   :  { %v276_v47 = vadd.f32 %v275_v42, %v262_v40  ;;  %v241_v48 = vadd.f32 %v240_v39, %v219_v44  ;;  %v263_v50 = vmul.f32 %v219_v44, %v219_v44 }
 0x105   :  { %v242_v52 = vadd.f32 %v241_v48, %v1295_v37  ;;  %v277_v53 = vadd.f32 %v276_v47, %v263_v50 }
 0x107   :  { %v243_v54 = vrot.slane %v242_v52, 4  ;;  %v278_v55 = vadd.f32 %v277_v53, %v264_v51 }
 0x109   :  { %v244_v57 = vadd.f32 %v243_v54, %v242_v52  ;;  %v279_v58 = vrot.slane %v278_v55, 4 }
 0x10b   :  { %v245_v59 = vrot.slane %v244_v57, 2  ;;  %v280_v60 = vadd.f32 %v279_v58, %v278_v55 }
 0x10d   :  { %v246_v62 = vadd.f32 %v245_v59, %v244_v57  ;;  %v281_v63 = vrot.slane %v280_v60, 2 }
 0x10f   :  { %v247_v0 = vrot.slane %v246_v62, 1  ;;  %v282_v1 = vadd.f32 %v281_v63, %v280_v60 }
 0x111   :  { %v248_v41 = vadd.f32 %v247_v0, %v246_v62  ;;  %v283_v3 = vrot.slane %v282_v1, 1 }
 0x113   :  { %v249_v4 = vmul.f32 0.008333334, %v248_v41  ;;  %v284_v6 = vadd.f32 %v283_v3, %v282_v1 }
 0x115   :  { %v285_v7 = vmul.f32 0.008333334, %v284_v6  ;;  %v286_v8 = vmul.f32 %v249_v4, %v249_v4 }
 0x117   :  { %v287_v9 = vsub.f32 %v285_v7, %v286_v8 }
 0x119   :  { %v288_v10 = vmax.f32 %v287_v9, 0.0 }
 0x11b   :  { %v290_v11 = vadd.f32 1e-05, %v288_v10 }
 0x11d   :  { %1057 = vrsqrt.f32 %v290_v11 }
 0x12a   :  { %v1058_v18 = vpop.eup %1057 }
 0x12b   :  { %v292_v19 = vmul.f32 %v1058_v18, %v289_v15  ;;  %v1050_v15 = vld [vmem:[%s1500_s9 + $0x30] sm:$0xff]   ;;  %v1052_v18 = vld [vmem:[%s1500_s9 + $0x20] sm:$0xff]  }
 0x12c   :  { %987 = vmatprep.subr.bf16.mxu0 %v1050_v15 }
 0x12d   :  { %v294_v21 = vmul.f32 %v292_v19, %v249_v4  ;;  %v300_v23 = vrot.slane %v292_v19, %v1307_v16  ;;  %988 = vmatpush3.bf16.msra.mxu0 %v1050_v15  ;;  %v1053_v19 = vld [vmem:[%s1500_s9 + $0x18] sm:$0xff]  }
 0x12f   :  { %v295_v24 = vsub.f32 %v293_v20, %v294_v21  ;;  %v315_v26 = vmul.f32 %v300_v23, %v219_v44  ;;  %v302_v27 = vmul.f32 %v300_v23, %v1220_v43  ;;  %v303_v28 = vmul.f32 %v300_v23, %v1226_v46  ;;  %v1054_v20 = vld [vmem:[%s1500_s9 + $0x10] sm:$0xff]   ;;  %v1055_v21 = vld [vmem:[%s1500_s9 + $0x8] sm:$0xff]  }
 0x130   :  { %v304_v29 = vmul.f32 %v300_v23, %v1223_v45  ;;  %v305_v31 = vmul.f32 %v300_v23, %v1231_v49  ;;  %v306_v33 = vmul.f32 %v300_v23, %v1241_v56  ;;  %v307_v34 = vmul.f32 %v300_v23, %v1253_v2 }
 0x131   :  { %v321_v30 = vrot.slane %v295_v24, %v1307_v16  ;;  %v308_v35 = vmul.f32 %v300_v23, %v1247_v61  ;;  %v309_v36 = vmul.f32 %v300_v23, %v1256_v5  ;;  %v310_v38 = vmul.f32 %v300_v23, %v1265_v12 }
 0x132   :  { %v311_v43 = vmul.f32 %v300_v23, %v1277_v22  ;;  %v312_v49 = vmul.f32 %v300_v23, %v1271_v17  ;;  %v313_v56 = vmul.f32 %v300_v23, %v1280_v25  ;;  %v314_v12 = vmul.f32 %v300_v23, %v1289_v32 }
 0x133   :  { %v323_v39 = vadd.f32 %v321_v30, %v302_v27  ;;  %v324_v46 = vadd.f32 %v321_v30, %v303_v28  ;;  %v325_v40 = vadd.f32 %v321_v30, %v304_v29  ;;  %v326_v45 = vadd.f32 %v321_v30, %v305_v31  ;;  %v1355_v27 = vld [vmem:[%s1501_s6] ss:$0 sm:$0xff] }
 0x134   :  { %v327_v42 = vadd.f32 %v321_v30, %v306_v33  ;;  %v328_v44 = vadd.f32 %v321_v30, %v307_v34  ;;  %v329_v51 = vadd.f32 %v321_v30, %v308_v35  ;;  %v331_v53 = vadd.f32 %v321_v30, %v310_v38 }
 0x135   :  { %v338_v47 = vmax.f32 %v323_v39, 0.0  ;;  %v339_v2 = vmax.f32 %v324_v46, 0.0  ;;  %v340_v48 = vmax.f32 %v325_v40, 0.0  ;;  %v341_v61 = vmax.f32 %v326_v45, 0.0 }
 0x136   :  { %v342_v50 = vmax.f32 %v327_v42, 0.0  ;;  %v343_v5 = vmax.f32 %v328_v44, 0.0  ;;  %v332_v54 = vadd.f32 %v321_v30, %v311_v43  ;;  %v330_v57 = vadd.f32 %v321_v30, %v309_v36 }
 0x137   :  { %v353_v22 = vpack.c.bf16 %v339_v2, %v338_v47  ;;  %v354_v52 = vpack.c.bf16 %v341_v61, %v340_v48  ;;  %v333_v58 = vadd.f32 %v321_v30, %v312_v49  ;;  %v334_v59 = vadd.f32 %v321_v30, %v313_v56 }
 0x138   :  { %v355_v55 = vpack.c.bf16 %v343_v5, %v342_v50  ;;  %v346_v17 = vmax.f32 %v331_v53, 0.0  ;;  %v347_v25 = vmax.f32 %v332_v54, 0.0  ;;  %v335_v60 = vadd.f32 %v321_v30, %v314_v12 }
 0x139   :  { %969 = vmatprep.mubr.bf16.mxu1 %v353_v22  ;;  %v336_v62 = vadd.f32 %v321_v30, %v315_v26  ;;  %v348_v63 = vmax.f32 %v333_v58, 0.0  ;;  %v349_v0 = vmax.f32 %v334_v59, 0.0  ;;  %v344_v3 = vmax.f32 %v329_v51, 0.0 }
 0x13a   :  { %970 = vmatmul.mubr.bf16.vlgmr.msra.gmra.mxu1 %v354_v52  ;;  %v357_v1 = vpack.c.bf16 %v347_v25, %v346_v17  ;;  %v350_v41 = vmax.f32 %v335_v60, 0.0  ;;  %v345_v4 = vmax.f32 %v330_v57, 0.0  ;;  %v316_v9 = vmul.f32 %v300_v23, %v1295_v37  ;;  %v1051_v37 = vld [vmem:[%s1500_s9 + $0x28] sm:$0xff]   ;;  %v1056_v23 = vld [vmem:[%s1500_s9] sm:$0xff]  }
 0x13b   :  { %973 = vmatprep.mubr.bf16.mxu1 %v355_v55  ;;  %v351_v32 = vmax.f32 %v336_v62, 0.0  ;;  %v358_v6 = vpack.c.bf16 %v349_v0, %v348_v63  ;;  %1025 = vmatpush3.bf16.msra.mxu1 %v1049_v14 }
 0x13c   :  { %v356_v8 = vpack.c.bf16 %v345_v4, %v344_v3  ;;  %v337_v10 = vadd.f32 %v321_v30, %v316_v9  ;;  %1018 = vmatprep.subr.bf16.mxu1 %v1050_v15  ;;  %989 = vmatprep.subr.bf16.mxu0 %v1051_v37 }
 0x13d   :  { %v359_v7 = vpack.c.bf16 %v351_v32, %v350_v41  ;;  %990 = vmatpush3.bf16.msra.mxu0 %v1051_v37 }
 0x13e   :  { %v352_v11 = vmax.f32 %v337_v10, 0.0  ;;  %991 = vmatprep.subr.bf16.mxu0 %v1052_v18 }
 0x13f   :  { %1026 = vmatpush3.bf16.msra.mxu1 %v1050_v15 }
 0x140   :  { %v360_v13 = vpack.c.bf16 %v352_v11, %v352_v11  ;;  %1019 = vmatprep.subr.bf16.mxu1 %v1051_v37 }
 0x141   :  { %992 = vmatpush3.bf16.msra.mxu0 %v1052_v18 }
 0x142   :  { %974 = vmatmul.mubr.bf16.gmra.mxu1 %v356_v8  ;;  %993 = vmatprep.subr.bf16.mxu0 %v1053_v19 }
 0x143   :  { %977 = vmatprep.mubr.bf16.mxu1 %v357_v1  ;;  %1027 = vmatpush3.bf16.msra.mxu1 %v1051_v37 }
 0x144   :  { %1020 = vmatprep.subr.bf16.mxu1 %v1052_v18 }
 0x145   :  { %994 = vmatpush3.bf16.msra.mxu0 %v1053_v19 }
 0x146   :  { %995 = vmatprep.subr.bf16.mxu0 %v1054_v20 }
 0x147   :  { %1028 = vmatpush3.bf16.msra.mxu1 %v1052_v18 }
 0x148   :  { %1021 = vmatprep.subr.bf16.mxu1 %v1053_v19 }
 0x149   :  { %996 = vmatpush3.bf16.msra.mxu0 %v1054_v20 }
 0x14a   :  { %978 = vmatmul.mubr.bf16.gmra.mxu1 %v358_v6  ;;  %997 = vmatprep.subr.bf16.mxu0 %v1055_v21 }
 0x14b   :  { %981 = vmatprep.mubr.bf16.mxu1 %v359_v7  ;;  %1029 = vmatpush3.bf16.msra.mxu1 %v1053_v19 }
 0x14c   :  { %1022 = vmatprep.subr.bf16.mxu1 %v1054_v20 }
 0x14d   :  { %998 = vmatpush3.bf16.msra.mxu0 %v1055_v21 }
 0x14e   :  { %999 = vmatprep.subr.bf16.mxu0 %v1056_v23 }
 0x14f   :  { %1030 = vmatpush3.bf16.msra.mxu1 %v1054_v20 }
 0x150   :  { %1023 = vmatprep.subr.bf16.mxu1 %v1055_v21 }
 0x151   :  { %1000 = vmatpush3.bf16.msra.mxu0 %v1056_v23 }
 0x152   :  { %982 = vmatmul.mubr.bf16.gmra.mxu1 %v360_v13 }
 0x153   :  { %1031 = vmatpush3.bf16.msra.mxu1 %v1055_v21 }
 0x154   :  { %1024 = vmatprep.subr.bf16.mxu1 %v1056_v23 }
 0x157   :  { %1032 = vmatpush3.bf16.msra.mxu1 %v1056_v23 }
 0x1fa   :  { %v971_v24 = vpop.f32.mrf.mxu1 }
 0x1fb   :  { %v1361_v31 = vadd.f32 %v971_v24, %v1355_v27 }
 0x1fc   :  { %v466_v26 = vpop.f32.mrf.mxu1 }
 0x1fd   :  { %v1358_v29 = vadd.f32 %v1355_v27, %v466_v26  ;;  %v551_v46 = vmul.f32 %v1361_v31, %v1361_v31 }
 0x1fe   :  { %v972_v28 = vpop.f32.mrf.mxu1 }
 0x1ff   :  { %v549_v35 = vmul.f32 %v1358_v29, %v1358_v29  ;;  %v1369_v36 = vadd.f32 %v972_v28, %v1355_v27 }
 0x200   :  { %v469_v30 = vpop.f32.mrf.mxu1 }
 0x201   :  { %v1364_v33 = vadd.f32 %v1355_v27, %v469_v30  ;;  %v552_v49 = vmul.f32 %v1369_v36, %v1369_v36 }
 0x202   :  { %v975_v34 = vpop.f32.mrf.mxu1 }
 0x203   :  { %v528_v38 = vadd.f32 %v1364_v33, %v1358_v29  ;;  %v550_v43 = vmul.f32 %v1364_v33, %v1364_v33  ;;  %v1385_v2 = vadd.f32 %v975_v34, %v1355_v27 }
 0x204   :  { %v482_v39 = vpop.f32.mrf.mxu1 }
 0x205   :  { %v529_v40 = vadd.f32 %v528_v38, %v1361_v31  ;;  %v564_v45 = vadd.f32 %v550_v43, %v549_v35  ;;  %v1379_v42 = vadd.f32 %v1355_v27, %v482_v39  ;;  %v555_v57 = vmul.f32 %v1385_v2, %v1385_v2 }
 0x206   :  { %v976_v44 = vpop.f32.mrf.mxu1 }
 0x207   :  { %v565_v56 = vadd.f32 %v564_v45, %v551_v46  ;;  %v530_v47 = vadd.f32 %v529_v40, %v1369_v36  ;;  %v553_v50 = vmul.f32 %v1379_v42, %v1379_v42  ;;  %v1394_v52 = vadd.f32 %v976_v44, %v1355_v27 }
 0x208   :  { %v485_v48 = vpop.f32.mrf.mxu1 }
 0x209   :  { %v531_v61 = vadd.f32 %v530_v47, %v1379_v42  ;;  %v566_v5 = vadd.f32 %v565_v56, %v552_v49  ;;  %v1391_v51 = vadd.f32 %v1355_v27, %v485_v48  ;;  %v556_v60 = vmul.f32 %v1394_v52, %v1394_v52 }
 0x20a   :  { %v979_v12 = vpop.f32.mrf.mxu1 }
 0x20b   :  { %v567_v22 = vadd.f32 %v566_v5, %v553_v50  ;;  %v532_v53 = vadd.f32 %v531_v61, %v1391_v51  ;;  %v554_v54 = vmul.f32 %v1391_v51, %v1391_v51  ;;  %v1409_v0 = vadd.f32 %v979_v12, %v1355_v27 }
 0x20c   :  { %v498_v55 = vpop.f32.mrf.mxu1 }
 0x20d   :  { %v533_v58 = vadd.f32 %v532_v53, %v1385_v2  ;;  %v568_v59 = vadd.f32 %v567_v22, %v554_v54  ;;  %v1403_v17 = vadd.f32 %v1355_v27, %v498_v55  ;;  %v559_v13 = vmul.f32 %v1409_v0, %v1409_v0 }
 0x20e   :  { %v980_v25 = vpop.f32.mrf.mxu1 }
 0x20f   :  { %v569_v62 = vadd.f32 %v568_v59, %v555_v57  ;;  %v534_v63 = vadd.f32 %v533_v58, %v1394_v52  ;;  %v557_v32 = vmul.f32 %v1403_v17, %v1403_v17  ;;  %v510_v8 = vadd.f32 %v980_v25, %v1355_v27 }
 0x210   :  { %v501_v1 = vpop.f32.mrf.mxu1 }
 0x211   :  { %v535_v41 = vadd.f32 %v534_v63, %v1403_v17  ;;  %v570_v3 = vadd.f32 %v569_v62, %v556_v60  ;;  %v502_v4 = vadd.f32 %v1355_v27, %v501_v1  ;;  %v560_v19 = vmul.f32 %v510_v8, %v510_v8  ;;  %v588_v60 = vld [vmem:[%s1502_s7] sm:$0x1] }
 0x212   :  { %v983_v6 = vpop.f32.mrf.mxu1  ;;  %v592_v1 = vld [vmem:[%s1503_s8] sm:$0x1] }
 0x213   :  { %v571_v7 = vadd.f32 %v570_v3, %v557_v32  ;;  %v536_v9 = vadd.f32 %v535_v41, %v502_v4  ;;  %v558_v10 = vmul.f32 %v502_v4, %v502_v4  ;;  %v1421_v23 = vadd.f32 %v983_v6, %v1355_v27 }
 0x214   :  { %v514_v11 = vpop.f32.mrf.mxu1 }
 0x215   :  { %v537_v14 = vadd.f32 %v536_v9, %v1409_v0  ;;  %v572_v15 = vadd.f32 %v571_v7, %v558_v10  ;;  %v515_v37 = vadd.f32 %v1355_v27, %v514_v11  ;;  %v563_v39 = vmul.f32 %v1421_v23, %v1421_v23 }
 0x216   :  { %v984_v18 = vpop.f32.mrf.mxu1 }
 0x217   :  { %v573_v20 = vadd.f32 %v572_v15, %v559_v13  ;;  %v538_v21 = vadd.f32 %v537_v14, %v510_v8  ;;  %v561_v28 = vmul.f32 %v515_v37, %v515_v37 }
 0x218   :  { %v517_v24 = vpop.f32.mrf.mxu1 }
 0x219   :  { %v539_v26 = vadd.f32 %v538_v21, %v515_v37  ;;  %v574_v30 = vadd.f32 %v573_v20, %v560_v19  ;;  %v518_v34 = vadd.f32 %v1355_v27, %v517_v24 }
 0x21b   :  { %v575_v35 = vadd.f32 %v574_v30, %v561_v28  ;;  %v540_v38 = vadd.f32 %v539_v26, %v518_v34  ;;  %v562_v43 = vmul.f32 %v518_v34, %v518_v34 }
 0x21d   :  { %v541_v46 = vadd.f32 %v540_v38, %v1421_v23  ;;  %v576_v40 = vadd.f32 %v575_v35, %v562_v43 }
 0x21f   :  { %v542_v45 = vrot.slane %v541_v46, 4  ;;  %v577_v44 = vadd.f32 %v576_v40, %v563_v39 }
 0x221   :  { %v543_v49 = vadd.f32 %v542_v45, %v541_v46  ;;  %v578_v56 = vrot.slane %v577_v44, 4 }
 0x223   :  { %v544_v47 = vrot.slane %v543_v49, 2  ;;  %v579_v48 = vadd.f32 %v578_v56, %v577_v44 }
 0x225   :  { %v545_v61 = vadd.f32 %v544_v47, %v543_v49  ;;  %v580_v50 = vrot.slane %v579_v48, 2 }
 0x227   :  { %v546_v5 = vrot.slane %v545_v61, 1  ;;  %v581_v12 = vadd.f32 %v580_v50, %v579_v48 }
 0x229   :  { %v547_v27 = vadd.f32 %v546_v5, %v545_v61  ;;  %v582_v22 = vrot.slane %v581_v12, 1 }
 0x22b   :  { %v548_v53 = vmul.f32 0.008333334, %v547_v27  ;;  %v583_v54 = vadd.f32 %v582_v22, %v581_v12 }
 0x22d   :  { %v584_v55 = vmul.f32 0.008333334, %v583_v54  ;;  %v585_v57 = vmul.f32 %v548_v53, %v548_v53 }
 0x22f   :  { %v586_v58 = vsub.f32 %v584_v55, %v585_v57 }
 0x231   :  { %v587_v59 = vmax.f32 %v586_v58, 0.0 }
 0x233   :  { %v589_v25 = vadd.f32 1e-05, %v587_v59  ;;  %v864_v59 = vld [vmem:[%s1504_s10] ss:$0 sm:$0xff] }
 0x235   :  { %1059 = vrsqrt.f32 %v589_v25 }
 0x242   :  { %v1060_v62 = vpop.eup %1059 }
 0x243   :  { %v591_v63 = vmul.f32 %v1060_v62, %v588_v60 }
 0x245   :  { %v593_v41 = vmul.f32 %v591_v63, %v548_v53  ;;  %v599_v32 = vrot.slane %v591_v63, %v1307_v16 }
 0x247   :  { %v594_v3 = vsub.f32 %v592_v1, %v593_v41  ;;  %v614_v6 = vmul.f32 %v599_v32, %v518_v34  ;;  %v601_v7 = vmul.f32 %v599_v32, %v1358_v29  ;;  %v602_v9 = vmul.f32 %v599_v32, %v1364_v33 }
 0x248   :  { %v609_v10 = vmul.f32 %v599_v32, %v1403_v17  ;;  %v610_v11 = vmul.f32 %v599_v32, %v502_v4  ;;  %v603_v13 = vmul.f32 %v599_v32, %v1361_v31  ;;  %v604_v14 = vmul.f32 %v599_v32, %v1369_v36 }
 0x249   :  { %v620_v15 = vrot.slane %v594_v3, %v1307_v16  ;;  %v611_v18 = vmul.f32 %v599_v32, %v1409_v0  ;;  %v612_v19 = vmul.f32 %v599_v32, %v510_v8  ;;  %v605_v20 = vmul.f32 %v599_v32, %v1379_v42 }
 0x24a   :  { %v606_v21 = vmul.f32 %v599_v32, %v1391_v51  ;;  %v613_v24 = vmul.f32 %v599_v32, %v515_v37  ;;  %v607_v29 = vmul.f32 %v599_v32, %v1385_v2  ;;  %v608_v33 = vmul.f32 %v599_v32, %v1394_v52 }
 0x24b   :  { %v622_v17 = vadd.f32 %v620_v15, %v601_v7  ;;  %v623_v4 = vadd.f32 %v620_v15, %v602_v9  ;;  %v630_v26 = vadd.f32 %v620_v15, %v609_v10  ;;  %v631_v31 = vadd.f32 %v620_v15, %v610_v11 }
 0x24c   :  { %v624_v28 = vadd.f32 %v620_v15, %v603_v13  ;;  %v625_v36 = vadd.f32 %v620_v15, %v604_v14  ;;  %v632_v30 = vadd.f32 %v620_v15, %v611_v18  ;;  %v633_v16 = vadd.f32 %v620_v15, %v612_v19 }
 0x24d   :  { %v637_v34 = vmax.f32 %v622_v17, 0.0  ;;  %v638_v0 = vmax.f32 %v623_v4, 0.0  ;;  %v645_v8 = vmax.f32 %v630_v26, 0.0  ;;  %v646_v35 = vmax.f32 %v631_v31, 0.0 }
 0x24e   :  { %v639_v42 = vmax.f32 %v624_v28, 0.0  ;;  %v640_v38 = vmax.f32 %v625_v36, 0.0  ;;  %v647_v51 = vmax.f32 %v632_v30, 0.0  ;;  %v648_v37 = vmax.f32 %v633_v16, 0.0 }
 0x24f   :  { %v652_v43 = vpack.c.bf16 %v638_v0, %v637_v34  ;;  %v656_v2 = vpack.c.bf16 %v646_v35, %v645_v8  ;;  %v626_v39 = vadd.f32 %v620_v15, %v605_v20  ;;  %v627_v52 = vadd.f32 %v620_v15, %v606_v21 }
 0x250   :  { %v653_v46 = vpack.c.bf16 %v640_v38, %v639_v42  ;;  %v657_v40 = vpack.c.bf16 %v648_v37, %v647_v51  ;;  %v634_v45 = vadd.f32 %v620_v15, %v613_v24  ;;  %v635_v44 = vadd.f32 %v620_v15, %v614_v6 }
 0x251   :  { %1001 = vmatprep.mubr.bf16.mxu0 %v652_v43  ;;  %1009 = vmatprep.mubr.bf16.mxu1 %v656_v2  ;;  %v641_v49 = vmax.f32 %v626_v39, 0.0  ;;  %v642_v56 = vmax.f32 %v627_v52, 0.0  ;;  %v628_v47 = vadd.f32 %v620_v15, %v607_v29  ;;  %v629_v48 = vadd.f32 %v620_v15, %v608_v33 }
 0x252   :  { %1002 = vmatmul.mubr.bf16.vlgmr.msra.gmra.mxu0 %v653_v46  ;;  %1010 = vmatmul.mubr.bf16.vlgmr.msra.gmra.mxu1 %v657_v40  ;;  %v649_v61 = vmax.f32 %v634_v45, 0.0  ;;  %v650_v50 = vmax.f32 %v635_v44, 0.0  ;;  %v615_v5 = vmul.f32 %v599_v32, %v1421_v23 }
 0x253   :  { %v654_v12 = vpack.c.bf16 %v642_v56, %v641_v49  ;;  %v643_v22 = vmax.f32 %v628_v47, 0.0  ;;  %v644_v53 = vmax.f32 %v629_v48, 0.0 }
 0x254   :  { %v658_v27 = vpack.c.bf16 %v650_v50, %v649_v61  ;;  %v636_v54 = vadd.f32 %v620_v15, %v615_v5 }
 0x255   :  { %1005 = vmatprep.mubr.bf16.mxu0 %v654_v12  ;;  %v655_v57 = vpack.c.bf16 %v644_v53, %v643_v22 }
 0x256   :  { %1013 = vmatprep.mubr.bf16.mxu1 %v658_v27  ;;  %v651_v55 = vmax.f32 %v636_v54, 0.0 }
 0x258   :  { %v659_v58 = vpack.c.bf16 %v651_v55, %v651_v55 }
 0x25a   :  { %1006 = vmatmul.mubr.bf16.gmra.mxu0 %v655_v57  ;;  %1014 = vmatmul.mubr.bf16.gmra.mxu1 %v659_v58 }
 0x312   :  { %v1003_v25 = vpop.f32.mrf.mxu0  ;;  %v1011_v60 = vpop.f32.mrf.mxu1 }
 0x313   :  { %v774_v62 = vadd.f32 %v1003_v25, %v864_v59  ;;  %v806_v23 = vadd.f32 %v1011_v60, %v864_v59 }
 0x314   :  { %v765_v63 = vpop.f32.mrf.mxu0  ;;  %v797_v1 = vpop.f32.mrf.mxu1 }
 0x315   :  { %829 = vst [vmem:[%s1505_s11 + $0x10] sm:$0xff] %v774_v62  ;;  %837 = vst [vmem:[%s1505_s11 + $0x50] sm:$0xff] %v806_v23  ;;  %v766_v41 = vadd.f32 %v864_v59, %v765_v63  ;;  %v798_v32 = vadd.f32 %v864_v59, %v797_v1 }
 0x316   :  { %v1004_v3 = vpop.f32.mrf.mxu0  ;;  %v1012_v6 = vpop.f32.mrf.mxu1 }
 0x317   :  { %827 = vst [vmem:[%s1505_s11] sm:$0xff] %v766_v41  ;;  %835 = vst [vmem:[%s1505_s11 + $0x40] sm:$0xff] %v798_v32  ;;  %v777_v7 = vadd.f32 %v1004_v3, %v864_v59  ;;  %v809_v9 = vadd.f32 %v1012_v6, %v864_v59 }
 0x318   :  { %v768_v10 = vpop.f32.mrf.mxu0  ;;  %v800_v11 = vpop.f32.mrf.mxu1 }
 0x319   :  { %830 = vst [vmem:[%s1505_s11 + $0x18] sm:$0xff] %v777_v7  ;;  %838 = vst [vmem:[%s1505_s11 + $0x58] sm:$0xff] %v809_v9  ;;  %v769_v13 = vadd.f32 %v864_v59, %v768_v10  ;;  %v801_v14 = vadd.f32 %v864_v59, %v800_v11 }
 0x31a   :  { %v1007_v15 = vpop.f32.mrf.mxu0  ;;  %v1015_v18 = vpop.f32.mrf.mxu1 }
 0x31b   :  { %828 = vst [vmem:[%s1505_s11 + $0x8] sm:$0xff] %v769_v13  ;;  %836 = vst [vmem:[%s1505_s11 + $0x48] sm:$0xff] %v801_v14  ;;  %v790_v19 = vadd.f32 %v1007_v15, %v864_v59  ;;  %v822_v20 = vadd.f32 %v1015_v18, %v864_v59 }
 0x31c   :  { %v781_v21 = vpop.f32.mrf.mxu0  ;;  %v813_v24 = vpop.f32.mrf.mxu1 }
 0x31d   :  { %833 = vst [vmem:[%s1505_s11 + $0x30] sm:$0xff] %v790_v19  ;;  %841 = vst [vmem:[%s1505_s11 + $0x70] sm:$0xff] %v822_v20  ;;  %v782_v29 = vadd.f32 %v864_v59, %v781_v21  ;;  %v814_v33 = vadd.f32 %v864_v59, %v813_v24 }
 0x31e   :  { %v1008_v17 = vpop.f32.mrf.mxu0  ;;  %v1016_v4 = vpop.f32.mrf.mxu1 }
 0x31f   :  { %831 = vst [vmem:[%s1505_s11 + $0x20] sm:$0xff] %v782_v29  ;;  %839 = vst [vmem:[%s1505_s11 + $0x60] sm:$0xff] %v814_v33  ;;  %v793_v26 = vadd.f32 %v1008_v17, %v864_v59 }
 0x320   :  { %v784_v31 = vpop.f32.mrf.mxu0  ;;  %v816_v28 = vpop.f32.mrf.mxu1 }
 0x321   :  { %834 = vst [vmem:[%s1505_s11 + $0x38] sm:$0xff] %v793_v26  ;;  %v785_v36 = vadd.f32 %v864_v59, %v784_v31  ;;  %v817_v30 = vadd.f32 %v864_v59, %v816_v28 }
 0x323   :  { %832 = vst [vmem:[%s1505_s11 + $0x28] sm:$0xff] %v785_v36  ;;  %840 = vst [vmem:[%s1505_s11 + $0x68] sm:$0xff] %v817_v30 }

</bundles_post_ra>
